<compile_context>
chip_gen: v6e
topology: v6e:2x2x1
jax: 0.10.0
libtpu: 0.0.40
codegen_flags: <defaults>
</compile_context>

<pallas_src>
import jax
import jax.numpy as jnp
from jax import lax
from jax.experimental import pallas as pl
from jax.experimental.pallas import tpu as pltpu


def model_kernel(in_ref, out_ref):
    # Packed (8, 128) f32 input tile, only cols 0:2 used:
    #   row  0    : x1                          (1, 2)
    #   rows 1-3  : randn(1, 3, .) / 2          (3, 2)   (pre-scaled on host)
    #   rows 4-5  : linear.weight^T             (2, 2)   wt[f, o] = W[o, f]
    #   row  6    : linear.bias                 (1, 2)
    #   row  7    : linear.bias / 2             (1, 2)   (pre-scaled on host)
    X = in_ref[0:4, 0:2]            # rows: [x1 ; xr/2]
    wt = in_ref[4:6, 0:2]
    b = in_ref[6:7, 0:2]
    hb = in_ref[7:8, 0:2]

    # rows @ W^T as two VPU FMA terms (F = 2): no MXU, no XLU lane-reduce.
    lin = X[:, 0:1] * wt[0:1, :] + X[:, 1:2] * wt[1:2, :]           # (4, 2)

    # row 0   : v1 = F.linear(x1, W, b)
    # rows 1-3: x3 = sigmoid(F.linear(xr/2, W)) * F.linear(xr/2, b/2)
    v1_rows = lin + b                                               # (4, 2)
    t = X[:, 0:1] * hb[0:1, 0:1] + X[:, 1:2] * hb[0:1, 1:2]         # (4, 1)
    # TODO(synk): PyTorch broadcast of (1,3,2) with (1,3) errors; t is broadcast over features.
    x3_rows = jax.nn.sigmoid(lin) * t                               # (4, 2)

    # v3 = torch.cat(v1, x3)
    # TODO(synk): torch.cat(v1, x3) is an invalid call; interpreted as cat([v1, x3], dim=seq).
    row = lax.broadcasted_iota(jnp.int32, (4, 2), 0)
    v3 = jnp.where(row == 0, v1_rows, x3_rows)                      # (4, 2)

    # v1n = v3 + v3 ; x2 = v1n.view(...) ; x2 = v3 + x2   =>   x2 = 3 * v3
    # (torch.relu(v1) and the second F.linear(xr/2, W) are dead -> dropped)
    x2 = 3.0 * v3                                                   # (4, 2)

    # data-dependent weight: w2[o, f] = bias[f] + x3[o, f]
    # TODO(synk): bias + x3 is (3, 2); F.linear needs a 2-D (out, in) weight -> first 2 rows.
    w2 = b + x3_rows[1:3, :]                                        # (2, 2), one vadd

    # return F.linear(F.linear(x2, w2) / 1, W)   ("/ 1" is a no-op -> dropped)
    # The intermediate's lane re-assembly is fused into the final linear:
    # out = (x2 @ w2[0])·wt_row0 + (x2 @ w2[1])·wt_row1  -- no constant vregs.
    o0 = x2[:, 0:1] * w2[0:1, 0:1] + x2[:, 1:2] * w2[0:1, 1:2]      # (4, 1)
    o1 = x2[:, 0:1] * w2[1:2, 0:1] + x2[:, 1:2] * w2[1:2, 1:2]      # (4, 1)
    out = o0 * wt[0:1, :] + o1 * wt[1:2, :]                         # (4, 2)

    # Single store of the valid region.  The padded remainder of the output
    # tile is intentionally left unwritten: the wrapper only reads out[0:4, 0:2].
    out_ref[0:4, 0:2] = out


@jax.jit
def model_forward(x1, xr, weight, bias):
    B, S, F = x1.shape            # (1, 1, 2)
    _, Sr, _ = xr.shape           # (1, 3, 2)
    f32 = jnp.float32

    # One (8, 128) tile built with a single concatenate + pad (one XLA fusion
    # feeding the kernel DMA); the /2 scalings are folded in here.
    payload = jnp.concatenate([
        x1.reshape(B * S, F).astype(f32),
        xr.reshape(B * Sr, F).astype(f32) * 0.5,
        weight.astype(f32).T,
        bias.reshape(1, F).astype(f32),
        bias.reshape(1, F).astype(f32) * 0.5,
    ], axis=0)                                          # (8, 2)
    packed = jnp.pad(payload, ((0, 0), (0, 128 - F)))   # (8, 128)

    out = pl.pallas_call(
        model_kernel,
        out_shape=jax.ShapeDtypeStruct((8, 128), f32),
        in_specs=[pl.BlockSpec(memory_space=pltpu.MemorySpace.VMEM)],
        out_specs=pl.BlockSpec(memory_space=pltpu.MemorySpace.VMEM),
        input_output_aliases={0: 0},     # reuse the packed HBM buffer for the output
    )(packed)

    # Invariant: only out[0:4, 0:2] is defined by the kernel.
    return out[0:B * S + B * Sr, 0:F].reshape(B, S + Sr, F)


if __name__ == "__main__":
    key = jax.random.PRNGKey(0)
    k_x, k_r, k_w, k_b = jax.random.split(key, 4)

    in_f = out_f = 2
    bound = 1.0 / (in_f ** 0.5)
    # Deterministic stand-in for torch.nn.Linear(2, 2) default init (uniform +/- 1/sqrt(in)).
    weight = jax.random.uniform(k_w, (out_f, in_f), jnp.float32, -bound, bound)
    bias = jax.random.uniform(k_b, (out_f,), jnp.float32, -bound, bound)

    # TODO(synk): the spec builds randn(1,1,1) / randn(1,3,1); the last dim must be 2
    # to be consumable by Linear(2, 2), so feature dim 2 is used.
    x1 = jax.random.normal(k_x, (1, 1, 2), jnp.float32)
    xr = jax.random.normal(k_r, (1, 3, 2), jnp.float32)  # stand-in for the in-forward torch.randn

    out = model_forward(x1, xr, weight, bias)
    jax.block_until_ready(out)
    print("KERNEL_OK")
</pallas_src>

<mosaic_0001>
module attributes {stable_mosaic.version = 11 : i64} {
  func.func @model_kernel(%arg0: memref<8x128xf32, #tpu.memory_space<vmem>>, %arg1: memref<8x128xf32, #tpu.memory_space<vmem>>) attributes {dimension_semantics = [], scalar_prefetch = 0 : i64, scratch_operands = 0 : i64, tpu.core_type = #tpu.core_type<tc>} {
    %c0 = arith.constant 0 : index
    %c0_0 = arith.constant 0 : index
    %0 = vector.load %arg0[%c0, %c0_0] : memref<8x128xf32, #tpu.memory_space<vmem>>, vector<4x2xf32>
    %c4 = arith.constant 4 : index
    %c0_1 = arith.constant 0 : index
    %1 = vector.load %arg0[%c4, %c0_1] : memref<8x128xf32, #tpu.memory_space<vmem>>, vector<2x2xf32>
    %c6 = arith.constant 6 : index
    %c0_2 = arith.constant 0 : index
    %2 = vector.load %arg0[%c6, %c0_2] : memref<8x128xf32, #tpu.memory_space<vmem>>, vector<1x2xf32>
    %c7 = arith.constant 7 : index
    %c0_3 = arith.constant 0 : index
    %3 = vector.load %arg0[%c7, %c0_3] : memref<8x128xf32, #tpu.memory_space<vmem>>, vector<1x2xf32>
    %4 = vector.extract_strided_slice %0 {offsets = [0, 0], sizes = [4, 1], strides = [1, 1]} : vector<4x2xf32> to vector<4x1xf32>
    %5 = vector.extract_strided_slice %1 {offsets = [0, 0], sizes = [1, 2], strides = [1, 1]} : vector<2x2xf32> to vector<1x2xf32>
    %6 = vector.broadcast %4 : vector<4x1xf32> to vector<4x2xf32>
    %7 = vector.broadcast %5 : vector<1x2xf32> to vector<4x2xf32>
    %8 = arith.mulf %6, %7 : vector<4x2xf32>
    %9 = vector.extract_strided_slice %0 {offsets = [0, 1], sizes = [4, 1], strides = [1, 1]} : vector<4x2xf32> to vector<4x1xf32>
    %10 = vector.extract_strided_slice %1 {offsets = [1, 0], sizes = [1, 2], strides = [1, 1]} : vector<2x2xf32> to vector<1x2xf32>
    %11 = vector.broadcast %9 : vector<4x1xf32> to vector<4x2xf32>
    %12 = vector.broadcast %10 : vector<1x2xf32> to vector<4x2xf32>
    %13 = arith.mulf %11, %12 : vector<4x2xf32>
    %14 = arith.addf %8, %13 : vector<4x2xf32>
    %15 = vector.broadcast %2 : vector<1x2xf32> to vector<4x2xf32>
    %16 = arith.addf %14, %15 : vector<4x2xf32>
    %17 = vector.extract_strided_slice %0 {offsets = [0, 0], sizes = [4, 1], strides = [1, 1]} : vector<4x2xf32> to vector<4x1xf32>
    %18 = vector.extract_strided_slice %3 {offsets = [0, 0], sizes = [1, 1], strides = [1, 1]} : vector<1x2xf32> to vector<1x1xf32>
    %19 = vector.broadcast %18 : vector<1x1xf32> to vector<4x1xf32>
    %20 = arith.mulf %17, %19 : vector<4x1xf32>
    %21 = vector.extract_strided_slice %0 {offsets = [0, 1], sizes = [4, 1], strides = [1, 1]} : vector<4x2xf32> to vector<4x1xf32>
    %22 = vector.extract_strided_slice %3 {offsets = [0, 1], sizes = [1, 1], strides = [1, 1]} : vector<1x2xf32> to vector<1x1xf32>
    %23 = vector.broadcast %22 : vector<1x1xf32> to vector<4x1xf32>
    %24 = arith.mulf %21, %23 : vector<4x1xf32>
    %25 = arith.addf %20, %24 : vector<4x1xf32>
    %26 = arith.negf %14 : vector<4x2xf32>
    %27 = math.exp %26 : vector<4x2xf32>
    %cst = arith.constant 1.000000e+00 : f32
    %28 = vector.broadcast %cst : f32 to vector<4x2xf32>
    %29 = arith.addf %28, %27 : vector<4x2xf32>
    %30 = arith.divf %28, %29 : vector<4x2xf32>
    %31 = vector.broadcast %25 : vector<4x1xf32> to vector<4x2xf32>
    %32 = arith.mulf %30, %31 : vector<4x2xf32>
    %33 = tpu.iota {dimensions = array<i32: 0>} : vector<4x2xi32>
    %c0_i32 = arith.constant 0 : i32
    %34 = vector.broadcast %c0_i32 : i32 to vector<4x2xi32>
    %35 = arith.cmpi eq, %33, %34 : vector<4x2xi32>
    %36 = arith.select %35, %16, %32 : vector<4x2xi1>, vector<4x2xf32>
    %cst_4 = arith.constant 3.000000e+00 : f32
    %37 = vector.broadcast %cst_4 : f32 to vector<4x2xf32>
    %38 = arith.mulf %37, %36 : vector<4x2xf32>
    %39 = vector.extract_strided_slice %32 {offsets = [1, 0], sizes = [2, 2], strides = [1, 1]} : vector<4x2xf32> to vector<2x2xf32>
    %40 = vector.broadcast %2 : vector<1x2xf32> to vector<2x2xf32>
    %41 = arith.addf %40, %39 : vector<2x2xf32>
    %42 = vector.extract_strided_slice %38 {offsets = [0, 0], sizes = [4, 1], strides = [1, 1]} : vector<4x2xf32> to vector<4x1xf32>
    %43 = vector.extract_strided_slice %41 {offsets = [0, 0], sizes = [1, 1], strides = [1, 1]} : vector<2x2xf32> to vector<1x1xf32>
    %44 = vector.broadcast %43 : vector<1x1xf32> to vector<4x1xf32>
    %45 = arith.mulf %42, %44 : vector<4x1xf32>
    %46 = vector.extract_strided_slice %38 {offsets = [0, 1], sizes = [4, 1], strides = [1, 1]} : vector<4x2xf32> to vector<4x1xf32>
    %47 = vector.extract_strided_slice %41 {offsets = [0, 1], sizes = [1, 1], strides = [1, 1]} : vector<2x2xf32> to vector<1x1xf32>
    %48 = vector.broadcast %47 : vector<1x1xf32> to vector<4x1xf32>
    %49 = arith.mulf %46, %48 : vector<4x1xf32>
    %50 = arith.addf %45, %49 : vector<4x1xf32>
    %51 = vector.extract_strided_slice %38 {offsets = [0, 0], sizes = [4, 1], strides = [1, 1]} : vector<4x2xf32> to vector<4x1xf32>
    %52 = vector.extract_strided_slice %41 {offsets = [1, 0], sizes = [1, 1], strides = [1, 1]} : vector<2x2xf32> to vector<1x1xf32>
    %53 = vector.broadcast %52 : vector<1x1xf32> to vector<4x1xf32>
    %54 = arith.mulf %51, %53 : vector<4x1xf32>
    %55 = vector.extract_strided_slice %38 {offsets = [0, 1], sizes = [4, 1], strides = [1, 1]} : vector<4x2xf32> to vector<4x1xf32>
    %56 = vector.extract_strided_slice %41 {offsets = [1, 1], sizes = [1, 1], strides = [1, 1]} : vector<2x2xf32> to vector<1x1xf32>
    %57 = vector.broadcast %56 : vector<1x1xf32> to vector<4x1xf32>
    %58 = arith.mulf %55, %57 : vector<4x1xf32>
    %59 = arith.addf %54, %58 : vector<4x1xf32>
    %60 = vector.extract_strided_slice %1 {offsets = [0, 0], sizes = [1, 2], strides = [1, 1]} : vector<2x2xf32> to vector<1x2xf32>
    %61 = vector.broadcast %50 : vector<4x1xf32> to vector<4x2xf32>
    %62 = vector.broadcast %60 : vector<1x2xf32> to vector<4x2xf32>
    %63 = arith.mulf %61, %62 : vector<4x2xf32>
    %64 = vector.extract_strided_slice %1 {offsets = [1, 0], sizes = [1, 2], strides = [1, 1]} : vector<2x2xf32> to vector<1x2xf32>
    %65 = vector.broadcast %59 : vector<4x1xf32> to vector<4x2xf32>
    %66 = vector.broadcast %64 : vector<1x2xf32> to vector<4x2xf32>
    %67 = arith.mulf %65, %66 : vector<4x2xf32>
    %68 = arith.addf %63, %67 : vector<4x2xf32>
    %c0_5 = arith.constant 0 : index
    %c0_6 = arith.constant 0 : index
    %69 = vector.load %arg1[%c0_5, %c0_6] : memref<8x128xf32, #tpu.memory_space<vmem>>, vector<4x2xf32>
    tpu.vector_store %arg1[%c0_5, %c0_6], %68 {strides = array<i32>} : memref<8x128xf32, #tpu.memory_space<vmem>>, vector<4x2xf32>,
    return
  }
}

</mosaic_0001>

<bundles_post_ra>
// kernel: model_forward.1
= control target key start
LH: loop header
LB: loop body
LE: loop exit
PB: predicated region body
PF: predicated region fallthrough
CT: control target
= control target key end

     0   :  { %v117_v2 = vmov 1   ;;  %v118_v3 = vmov 0   ;;  %s119_s10 = smov 127   ;;  %v17_v7 = vlaneseq  ;;  %vm98_vm1 = vcmask 11264   ;;  %s148_s0 = inlined_call_operand.vmem [shape: f32[8,128], index: 0, kind: input, shape index: {}, may-alias: {0,1}]   ;;  %s149_s1 = inlined_call_operand.vmem [shape: f32[8,128], index: 1, kind: output, shape index: {}, may-alias: {0,1}]  }
   0x1   :  { %v8_v0 = vld [vmem:[%s148_s0] sm:$0xf]  ;;  %v105_v1 = vld [vmem:[%s148_s0 + $0x7] ss:$0 sm:$0xff]  ;;  %111 = vset.pattern.permute.xlu1 %v117_v2  ;;  %110 = vset.pattern.permute.xlu0 %v118_v3  ;;  %v9_v11 = vld [vmem:[%s148_s0 + $0x4] sm:$0x3] }
   0x2   :  { %v41_v4 = vmul.f32 %v105_v1, %v8_v0  ;;  %23 = vperm.xlu1 %111, %v8_v0   ;;  %v18_v8 = vshrl.u32 %v17_v7, 7  ;;  %v104_v23 = vld [vmem:[%s148_s0 + $0x6] ss:$0 sm:$0xff] }
   0x4   :  { %43 = vrot.lane.b32.xlu0 %v41_v4, %s119_s10  ;;  %v28_v9 = vsub.s32 1, %v18_v8  ;;  %v19_v10 = vsub.s32 0, %v18_v8  ;;  %vm61_vm0 = vcmp.eq.s32.totalorder %v18_v8, 0  ;;  %v77_v25 = vsub.s32 2, %v18_v8 }
   0x6   :  { %112 = vset.pattern.permute.xlu1 %v118_v3  ;;  %v29_v12 = vrot.slane %v9_v11, %v28_v9  ;;  %v20_v13 = vrot.slane %v9_v11, %v19_v10 }
   0x8   :  { %14 = vperm.xlu0 %110, %v8_v0  }
  0x76   :  { %v44_v5 = vpop.permute.xlu0 %43 }
  0x77   :  { %v46_v6 = vadd.f32 %v44_v5, %v41_v4 }
  0x79   :  { %55 = vperm.xlu1 %112, %v46_v6  }
  0x7d   :  { %v24_v14 = vpop.permute.xlu1 %23 }
  0x7e   :  { %v30_v16 = vmul.f32 %v29_v12, %v24_v14 }
  0x83   :  { %v15_v15 = vpop.permute.xlu0 %14 }
  0x84   :  { %v21_v17 = vmul.f32 %v20_v13, %v15_v15 }
  0x86   :  { %v31_v18 = vadd.f32 %v30_v16, %v21_v17 }
  0x88   :  { %v106_v19 = vmul.f32 -1.442695, %v31_v18  ;;  %v36_v26 = vadd.f32 %v104_v23, %v31_v18 }
  0x8a   :  { %113 = vpow2.f32 %v106_v19 }
  0x97   :  { %v114_v20 = vpop.eup %113 }
  0x98   :  { %v50_v21 = vadd.f32 1.0, %v114_v20 }
  0x9a   :  { %115 = vrcp.f32 %v50_v21 }
  0xa7   :  { %v116_v22 = vpop.eup %115 }
  0xf4   :  { %v56_v24 = vpop.permute.xlu1 %55 }
  0xf5   :  { %v58_v27 = vmul.f32 %v116_v22, %v56_v24 }
  0xf7   :  { %v62_v28 = vsel %vm61_vm0, %v36_v26, %v58_v27  ;;  %v64_v29 = vadd.f32 %v104_v23, %v58_v27 }
  0xf8   :  { %v63_v30 = vmul.f32 3.0, %v62_v28 }
  0xf9   :  { %v68_v31 = vrot.slane %v64_v29, %v28_v9  ;;  %v78_v32 = vrot.slane %v64_v29, %v77_v25 }
  0xfb   :  { %v79_v33 = vmul.f32 %v78_v32, %v63_v30  ;;  %v69_v34 = vmul.f32 %v68_v31, %v63_v30 }
  0xfd   :  { %81 = vrot.lane.b32.xlu0 %v79_v33, %s119_s10  ;;  %71 = vrot.lane.b32.xlu1 %v69_v34, %s119_s10 }
 0x16f   :  { %v82_v35 = vpop.permute.xlu0 %81  ;;  %v72_v36 = vpop.permute.xlu1 %71 }
 0x170   :  { %v84_v37 = vadd.f32 %v82_v35, %v79_v33  ;;  %v74_v38 = vadd.f32 %v72_v36, %v69_v34 }
 0x172   :  { %93 = vperm.xlu0 %110, %v84_v37   ;;  %87 = vperm.xlu1 %112, %v74_v38  }
 0x1ed   :  { %v94_v39 = vpop.permute.xlu0 %93  ;;  %v88_v40 = vpop.permute.xlu1 %87 }
 0x1ee   :  { %v96_v41 = vmul.f32 %v94_v39, %v29_v12  ;;  %v90_v42 = vmul.f32 %v88_v40, %v20_v13 }
 0x1f0   :  { %v97_v43 = vadd.f32 %v96_v41, %v90_v42 }
 0x1f2   :  { %99 = vst.msk [vmem:[%s149_s1] sm:$0xf] %vm98_vm1, %v97_v43 }

</bundles_post_ra>
